<compile_context>
chip_gen: v7x
topology: tpu7x:2x2x1
jax: 0.10.0
libtpu: 0.0.40
codegen_flags: <defaults>
</compile_context>

<pallas_src>
import functools

import jax
import jax.numpy as jnp
from jax.experimental import pallas as pl
from jax.experimental.pallas import tpu as pltpu


_LANE = 128     # lane granularity (last dim)
_SUBLANE = 8    # sublane granularity (second-to-last dim, f32)

# Conservative VMEM budget for the fused (weight-resident) path; chosen to fit
# comfortably inside the 32 MiB scoped limit on every generation (v7x has
# 64 MiB physical / 32 MiB default scoped, v5e/v6e have 128 MiB physical).
_FUSED_VMEM_BUDGET = 24 * 1024 * 1024
_VMEM_LIMIT_BYTES = 32 * 1024 * 1024


def _round_up(x, m):
    return ((x + m - 1) // m) * m


def _choose_tile(padded_dim, max_tile, gran):
    """Largest multiple of `gran` that divides `padded_dim` and is <= max_tile."""
    t = min(max_tile, padded_dim)
    t = max((t // gran) * gran, gran)
    while padded_dim % t:
        t -= gran
    return t


def prepare_split_bias_params(weight, bias, dtype=jnp.float32):
    """One-time parameter prep -- call OUTSIDE the hot path / training loop.

    weight: (OUT, IN) float32  (PyTorch nn.Linear layout)
    bias:   (OUT,)    float32

    Returns:
      w_t_pad: (Kp, Np) = (round_up(IN,128), round_up(OUT,128)); transposed so
               the kernel output's last dim (OUT) is lane-dense; zero padded.
      b_pad:   (1, Np) zero-padded bias row (kept f32 for exact accumulation).
    Zero padding keeps the math exact; padded columns are sliced off later.
    `dtype=jnp.bfloat16` is available for bf16-native MXUs (v6e/v7x) if the
    accuracy tradeoff is acceptable; accumulation stays f32 either way.
    """
    OUT, IN = weight.shape
    Kp = _round_up(IN, _LANE)
    Np = _round_up(OUT, _LANE)
    w_t_pad = jnp.pad(weight.T.astype(dtype), ((0, Kp - IN), (0, Np - OUT)))
    b_pad = jnp.pad(bias.astype(jnp.float32).reshape(1, OUT),
                    ((0, 0), (0, Np - OUT)))
    return w_t_pad, b_pad


# ---------------------------------------------------------------------------
# Fused path: whole weight/bias VMEM-resident, tile only M, no accumulator.
# ---------------------------------------------------------------------------
def _split_bias_fused_kernel(x_ref, wt_ref, b_ref, o_ref):
    o_ref[...] = (
        jnp.dot(x_ref[...], wt_ref[...], preferred_element_type=jnp.float32)
        + b_ref[...]
    ).astype(o_ref.dtype)


# ---------------------------------------------------------------------------
# Fallback path: tiled (M, N, K) grid with an f32 accumulator (large layers).
# ---------------------------------------------------------------------------
def _split_bias_tiled_kernel(x_ref, wt_ref, b_ref, o_ref, acc_ref):
    k = pl.program_id(2)
    partial = jnp.dot(x_ref[...], wt_ref[...],
                      preferred_element_type=jnp.float32)

    @pl.when(k == 0)
    def _init():
        # Fuse the bias into the first K step: no separate broadcast-store.
        acc_ref[...] = partial + b_ref[...]

    @pl.when(k > 0)
    def _accum():
        acc_ref[...] += partial

    @pl.when(k == pl.num_programs(2) - 1)
    def _finalize():
        o_ref[...] = acc_ref[...].astype(o_ref.dtype)


def split_bias_linear(x, w_t_pad, b_pad, out_features, *,
                      tm_max=256, tn_max=512, tk_max=512):
    """y = x @ W.T + bias  ==  SplitBias(nn.Linear(IN, OUT)).forward(x), 2-D input.

    x:        (B, IN)  float32
    w_t_pad:  (Kp, Np) from prepare_split_bias_params (already transposed/padded)
    b_pad:    (1, Np)  from prepare_split_bias_params
    """
    B, IN = x.shape
    Kp, Np = w_t_pad.shape
    assert Kp >= IN and Np >= out_features

    Mp = _round_up(B, _SUBLANE)

    # Zero-pad activations only when needed (zero rows/cols are exact; padded
    # weight rows are already zero so padded K contributes nothing).
    if (B, IN) != (Mp, Kp):
        x = jnp.pad(x, ((0, Mp - B), (0, Kp - IN)))

    # Cap tm at Mp//2 when there are >=2 sublane blocks so the "parallel" M
    # axis has >=2 blocks and v7x's second TensorCore gets work.
    tm_cap = min(tm_max, Mp if Mp < 2 * _SUBLANE else max(Mp // 2, _SUBLANE))
    tm = _choose_tile(Mp, tm_cap, _SUBLANE)

    itemsize = jnp.dtype(w_t_pad.dtype).itemsize
    fused_bytes = (2 * tm * Kp * 4            # x tile, double-buffered
                   + 2 * Kp * Np * itemsize   # weight (resident, 2 buffers)
                   + 2 * Np * 4               # bias
                   + 2 * tm * Np * 4)         # output tile
    use_fused = fused_bytes <= _FUSED_VMEM_BUDGET

    if use_fused:
        grid = (Mp // tm,)
        cost = pl.CostEstimate(
            flops=2 * Mp * Kp * Np,
            transcendentals=0,
            bytes_accessed=4 * (Mp * Kp + Np + Mp * Np) + itemsize * Kp * Np,
        )
        out = pl.pallas_call(
            _split_bias_fused_kernel,
            out_shape=jax.ShapeDtypeStruct((Mp, Np), x.dtype),
            grid_spec=pltpu.PrefetchScalarGridSpec(
                num_scalar_prefetch=0,
                grid=grid,
                in_specs=[
                    pl.BlockSpec((tm, Kp), lambda i: (i, 0),
                                 memory_space=pltpu.MemorySpace.VMEM),
                    pl.BlockSpec((Kp, Np), lambda i: (0, 0),
                                 memory_space=pltpu.MemorySpace.VMEM),
                    pl.BlockSpec((1, Np), lambda i: (0, 0),
                                 memory_space=pltpu.MemorySpace.VMEM),
                ],
                out_specs=pl.BlockSpec((tm, Np), lambda i: (i, 0),
                                       memory_space=pltpu.MemorySpace.VMEM),
            ),
            compiler_params=pltpu.CompilerParams(
                dimension_semantics=("parallel",),
                vmem_limit_bytes=_VMEM_LIMIT_BYTES,
            ),
            cost_estimate=cost,
        )(x, w_t_pad, b_pad)
    else:
        # Large-layer fallback: tiled (M, N, K) grid + f32 accumulator.
        tn = _choose_tile(Np, tn_max, _LANE)
        tk = _choose_tile(Kp, tk_max, _LANE)
        grid = (Mp // tm, Np // tn, Kp // tk)
        cost = pl.CostEstimate(
            flops=2 * Mp * Kp * Np,
            transcendentals=0,
            bytes_accessed=(4 * Mp * Kp * (Np // tn)
                            + itemsize * Kp * Np * (Mp // tm)
                            + 4 * Np + 4 * Mp * Np),
        )
        out = pl.pallas_call(
            _split_bias_tiled_kernel,
            out_shape=jax.ShapeDtypeStruct((Mp, Np), x.dtype),
            grid_spec=pltpu.PrefetchScalarGridSpec(
                num_scalar_prefetch=0,
                grid=grid,
                in_specs=[
                    pl.BlockSpec((tm, tk), lambda i, j, k: (i, k),
                                 memory_space=pltpu.MemorySpace.VMEM),
                    pl.BlockSpec((tk, tn), lambda i, j, k: (k, j),
                                 memory_space=pltpu.MemorySpace.VMEM),
                    pl.BlockSpec((1, tn), lambda i, j, k: (0, j),
                                 memory_space=pltpu.MemorySpace.VMEM),
                ],
                out_specs=pl.BlockSpec((tm, tn), lambda i, j, k: (i, j),
                                       memory_space=pltpu.MemorySpace.VMEM),
                scratch_shapes=[pltpu.VMEM((tm, tn), jnp.float32)],
            ),
            compiler_params=pltpu.CompilerParams(
                dimension_semantics=("parallel", "parallel", "arbitrary"),
                vmem_limit_bytes=_VMEM_LIMIT_BYTES,
            ),
            cost_estimate=cost,
        )(x, w_t_pad, b_pad)

    # Slice off padding only if there is any (small-batch path is launch-bound;
    # avoid an extra XLA op when shapes are already aligned).
    if (Mp, Np) != (B, out_features):
        out = out[:B, :out_features]
    return out


if __name__ == "__main__":
    key = jax.random.PRNGKey(0)
    k_x, k_w, k_b = jax.random.split(key, 3)

    # Small shapes consistent with the halfcheetah MLP policy layer.
    B, IN, OUT = 8, 32, 64
    x = jax.random.normal(k_x, (B, IN), dtype=jnp.float32)
    bound = 1.0 / (IN ** 0.5)  # PyTorch-like Linear init U(-1/sqrt(IN), 1/sqrt(IN))
    weight = jax.random.uniform(k_w, (OUT, IN), dtype=jnp.float32,
                                minval=-bound, maxval=bound)
    bias = jax.random.uniform(k_b, (OUT,), dtype=jnp.float32,
                              minval=-bound, maxval=bound)

    # One-time prep (transpose + lane padding) outside the hot path.
    w_t_pad, b_pad = prepare_split_bias_params(weight, bias)
    w_t_pad, b_pad = jax.block_until_ready((w_t_pad, b_pad))

    fwd = jax.jit(functools.partial(split_bias_linear, out_features=OUT))
    out = jax.block_until_ready(fwd(x, w_t_pad, b_pad))

    ref = x @ weight.T + bias.reshape(1, -1)
    assert out.shape == (B, OUT)
    assert jnp.allclose(out, ref, atol=1e-5, rtol=1e-5)

    # Larger layer: exercises the multi-M-block fused path (weight still
    # VMEM-resident, 2 M blocks -> both TensorCores on v7x).
    B2, IN2, OUT2 = 512, 640, 384
    x2 = jax.random.normal(k_x, (B2, IN2), dtype=jnp.float32)
    w2 = jax.random.uniform(k_w, (OUT2, IN2), dtype=jnp.float32,
                            minval=-0.05, maxval=0.05)
    b2 = jax.random.uniform(k_b, (OUT2,), dtype=jnp.float32,
                            minval=-0.05, maxval=0.05)
    w2_pad, b2_pad = prepare_split_bias_params(w2, b2)
    out2 = jax.block_until_ready(split_bias_linear(x2, w2_pad, b2_pad, OUT2))
    ref2 = jnp.dot(x2, w2.T, precision=jax.lax.Precision.HIGHEST) + b2.reshape(1, -1)
    assert out2.shape == (B2, OUT2)
    assert jnp.allclose(out2, ref2, atol=1e-3, rtol=1e-3)

    print("KERNEL_OK")
</pallas_src>

<mosaic_0001>
module attributes {stable_mosaic.version = 11 : i64} {
  func.func @_split_bias_fused_kernel(%arg0: i32, %arg1: memref<8x128xf32, #tpu.memory_space<vmem>>, %arg2: memref<128x128xf32, #tpu.memory_space<vmem>>, %arg3: memref<1x128xf32, #tpu.memory_space<vmem>>, %arg4: memref<8x128xf32, #tpu.memory_space<vmem>>) attributes {dimension_semantics = [#tpu.dimension_semantics<parallel>], iteration_bounds = array<i64: 1>, scalar_prefetch = 0 : i64, scratch_operands = 0 : i64, tpu.core_type = #tpu.core_type<tc>, window_params = [{transform_indices = @transform_0, window_bounds = array<i64: 8, 128>}, {pipeline_mode = #tpu.pipeline_mode<synchronous>, transform_indices = @transform_1, window_bounds = array<i64: 128, 128>}, {pipeline_mode = #tpu.pipeline_mode<synchronous>, transform_indices = @transform_2, window_bounds = array<i64: 1, 128>}, {transform_indices = @transform_3, window_bounds = array<i64: 8, 128>}]} {
    %c0 = arith.constant 0 : index
    %c0_0 = arith.constant 0 : index
    %0 = vector.load %arg1[%c0, %c0_0] : memref<8x128xf32, #tpu.memory_space<vmem>>, vector<8x128xf32>
    %c0_1 = arith.constant 0 : index
    %c0_2 = arith.constant 0 : index
    %1 = vector.load %arg2[%c0_1, %c0_2] : memref<128x128xf32, #tpu.memory_space<vmem>>, vector<128x128xf32>
    %cst = arith.constant dense<0.000000e+00> : vector<8x128xf32>
    %2 = tpu.matmul %0, %1, %cst {dimension_numbers = #tpu.dot_dimension_numbers<[1], [0], [0], [1], [0, 0, 1, 1], [], []>} : vector<8x128xf32>, vector<128x128xf32>, vector<8x128xf32> -> vector<8x128xf32>
    %c0_3 = arith.constant 0 : index
    %c0_4 = arith.constant 0 : index
    %3 = vector.load %arg3[%c0_3, %c0_4] : memref<1x128xf32, #tpu.memory_space<vmem>>, vector<1x128xf32>
    %4 = vector.broadcast %3 : vector<1x128xf32> to vector<8x128xf32>
    %5 = arith.addf %2, %4 : vector<8x128xf32>
    %c0_5 = arith.constant 0 : index
    %c0_6 = arith.constant 0 : index
    %6 = vector.load %arg4[%c0_5, %c0_6] : memref<8x128xf32, #tpu.memory_space<vmem>>, vector<8x128xf32>
    tpu.vector_store %arg4[%c0_5, %c0_6], %5 {strides = array<i32>} : memref<8x128xf32, #tpu.memory_space<vmem>>, vector<8x128xf32>,
    return
  }
  func.func @transform_0(%arg0: i32) -> (i32, i32) {
    %c0_i32 = arith.constant 0 : i32
    %c0_i32_0 = arith.constant 0 : i32
    return %arg0, %c0_i32 : i32, i32
  }
  func.func @transform_1(%arg0: i32) -> (i32, i32) {
    %c0_i32 = arith.constant 0 : i32
    %c0_i32_0 = arith.constant 0 : i32
    %c0_i32_1 = arith.constant 0 : i32
    return %c0_i32, %c0_i32_0 : i32, i32
  }
  func.func @transform_2(%arg0: i32) -> (i32, i32) {
    %c0_i32 = arith.constant 0 : i32
    %c0_i32_0 = arith.constant 0 : i32
    %c0_i32_1 = arith.constant 0 : i32
    return %c0_i32, %c0_i32_0 : i32, i32
  }
  func.func @transform_3(%arg0: i32) -> (i32, i32) {
    %c0_i32 = arith.constant 0 : i32
    %c0_i32_0 = arith.constant 0 : i32
    return %arg0, %c0_i32 : i32, i32
  }
}

</mosaic_0001>

<bundles_post_ra>
// kernel: split_bias_linear.1
= control target key start
LH: loop header
LB: loop body
LE: loop exit
PB: predicated region body
PF: predicated region fallthrough
CT: control target
= control target key end

     0   :  { %8 = vsyncpa [#allocation3], 0  ;;  %s328_s0 = inlined_call_operand.vmem [shape: f32[8,128], index: 0, kind: input, shape index: {}]   ;;  %s329_s1 = inlined_call_operand.hbm [shape: f32[128,128], index: 1, kind: input, shape index: {}]   ;;  %s330_s2 = inlined_call_operand.vmem [shape: f32[1,128], index: 2, kind: input, shape index: {}]   ;;  %s331_s3 = inlined_call_operand.hbm [shape: f32[8,128], index: 3, kind: output, shape index: {}]  }
   0x1   :  { %9 = vsyncpa [#allocation4], 0  ;;  %s271_s12 = smov [#allocation2]   ;;  %s223_s16 = scalar_lea.hbm %s329_s1, 2048 }
   0x2   :  { %s17_s13 = sshll.u32 %s271_s12, 4  ;;  %p224_p0 = scmp.ne.s32.totalorder %s329_s1, %s223_s16  ;;  %s18_s13 = int_to_ptr.vmem [resolvable:$true] %s17_s13 }
   0x3   :  { %p227_p1 = scmp.lt.u32.totalorder %s223_s16, %s329_s1 }
   0x5   :  { %p229_p2 = pnand %p227_p1, %p224_p0 }
   0x7   :  { %232 = shalt.err (!%p229_p2)
}
   0x8   :  { %s233_s21 = scalar_lea.vmem %s18_s13, 2048  ;;  %p238_p4 = scmp.lt.s32.totalorder %s18_s13, %s18_s13 }
   0x9   :  { %p234_p3 = scmp.ne.s32.totalorder %s18_s13, %s233_s21  ;;  %p239_p5 = scmp.lt.s32.totalorder %s233_s21, %s233_s21 }
   0xb   :  { %p240_p6 = por %p239_p5, %p238_p4 }
   0xd   :  { %p241_p7 = pnand %p240_p6, %p234_p3 }
   0xf   :  { %244 = shalt.err (!%p241_p7)
}
  0x10   :  { %s272_s22 = smov 128   ;;  %s273_s23 = smov 8  }
  0x11   :  { %23 = dma.hbm_to_vmem [thread:$0]  %s329_s1, 2048, %s18_s13, [#allocation3], %s272_s22, %s272_s22, %s273_s23  }
  0x12   :  { %267 = dma.done.wait [#allocation3], 2048  }
  0x13   :  { %268 = vsyncadd [#allocation3], 4294965248  ;;  %v274_v0 = vmov 0.0|0.0   ;;  %vm275_vm0 = vmmov 0   ;;  %v276_v1 = vmov 0.0   ;;  %v30_v2 = vld [vmem:[#allocation2] sm:$0xff] }
  0x14   :  { %192 = vmatprep.subr.bf16.mxu0 %v274_v0  ;;  %189 = vmatprep.mubr.msk.f32.mxu0 %vm275_vm0, %v276_v1  ;;  %v31_v3 = vld [vmem:[#allocation2 + $0x8] sm:$0xff]  ;;  %v32_v4 = vld [vmem:[#allocation2 + $0x10] sm:$0xff]  ;;  %v33_v6 = vld [vmem:[#allocation2 + $0x18] sm:$0xff]  ;;  %s277_s29 = smov [#allocation5]  }
  0x15   :  { %v193_v5 = vpack.c.bf16 %v31_v3, %v30_v2  ;;  %v196_v7 = vpack.c.bf16 %v33_v6, %v32_v4  ;;  %v34_v8 = vld [vmem:[#allocation2 + $0x20] sm:$0xff]  ;;  %v35_v9 = vld [vmem:[#allocation2 + $0x28] sm:$0xff]  ;;  %v36_v11 = vld [vmem:[#allocation2 + $0x30] sm:$0xff]  ;;  %s130_s30 = sshll.u32 %s277_s29, 4  ;;  %s131_s30 = int_to_ptr.vmem [resolvable:$true] %s130_s30 }
  0x16   :  { %v199_v10 = vpack.c.bf16 %v35_v9, %v34_v8  ;;  %v37_v12 = vld [vmem:[#allocation2 + $0x38] sm:$0xff]  ;;  %v38_v14 = vld [vmem:[#allocation2 + $0x40] sm:$0xff]  ;;  %v39_v15 = vld [vmem:[#allocation2 + $0x48] sm:$0xff]  ;;  %s245_s4 = scalar_lea.vmem %s131_s30, 128  ;;  %p250_p9 = scmp.lt.s32.totalorder %s131_s30, %s131_s30 }
  0x17   :  { %194 = vmatpush3.bf16.msra.mxu0 %v193_v5  ;;  %v202_v13 = vpack.c.bf16 %v37_v12, %v36_v11  ;;  %v205_v16 = vpack.c.bf16 %v39_v15, %v38_v14  ;;  %v40_v17 = vld [vmem:[#allocation2 + $0x50] sm:$0xff]  ;;  %v41_v18 = vld [vmem:[#allocation2 + $0x58] sm:$0xff]  ;;  %v42_v20 = vld [vmem:[#allocation2 + $0x60] sm:$0xff]  ;;  %p246_p8 = scmp.ne.s32.totalorder %s131_s30, %s245_s4  ;;  %p251_p10 = scmp.lt.s32.totalorder %s245_s4, %s245_s4 }
  0x18   :  { %195 = vmatprep.subr.bf16.mxu0 %v274_v0  ;;  %v208_v19 = vpack.c.bf16 %v41_v18, %v40_v17  ;;  %v43_v21 = vld [vmem:[#allocation2 + $0x68] sm:$0xff]  ;;  %v44_v23 = vld [vmem:[#allocation2 + $0x70] sm:$0xff]  ;;  %v45_v24 = vld [vmem:[#allocation2 + $0x78] sm:$0xff] }
  0x19   :  { %v211_v22 = vpack.c.bf16 %v43_v21, %v42_v20  ;;  %v214_v25 = vpack.c.bf16 %v45_v24, %v44_v23  ;;  %v29_v26 = vld [vmem:[%s328_s0] sm:$0xff]  ;;  %p252_p11 = por %p251_p10, %p250_p9 }
  0x1a   :  { %v139_v27 = vld [vmem:[%s330_s2] ss:$0 sm:$0xff] }
  0x1b   :  { %197 = vmatpush3.bf16.msra.mxu0 %v196_v7  ;;  %p253_p12 = pnand %p252_p11, %p246_p8 }
  0x1c   :  { %198 = vmatprep.subr.bf16.mxu0 %v274_v0 }
  0x1f   :  { %200 = vmatpush3.bf16.msra.mxu0 %v199_v10 }
  0x20   :  { %201 = vmatprep.subr.bf16.mxu0 %v274_v0 }
  0x23   :  { %203 = vmatpush3.bf16.msra.mxu0 %v202_v13 }
  0x24   :  { %204 = vmatprep.subr.bf16.mxu0 %v274_v0 }
  0x27   :  { %206 = vmatpush3.bf16.msra.mxu0 %v205_v16 }
  0x28   :  { %207 = vmatprep.subr.bf16.mxu0 %v274_v0 }
  0x2b   :  { %209 = vmatpush3.bf16.msra.mxu0 %v208_v19 }
  0x2c   :  { %210 = vmatprep.subr.bf16.mxu0 %v274_v0 }
  0x2f   :  { %212 = vmatpush3.bf16.msra.mxu0 %v211_v22 }
  0x30   :  { %213 = vmatprep.subr.bf16.mxu0 %v274_v0 }
  0x33   :  { %215 = vmatpush3.bf16.msra.mxu0 %v214_v25 }
  0x36   :  { %190 = vmatmul.mubr.f32.vlgmr.msra.gmra.mrb[0].mxu0 %v29_v26 }
 0x109   :  { %v119_v28 = vpop.f32.mrb[0].mxu0 }
 0x10a   :  { %v120_v29 = vadd.f32 %v139_v27, %v119_v28  ;;  %v191_v30 = vpop.f32.mrb[1].mxu0 }
 0x10c   :  { %123 = vst [vmem:[#allocation5] sm:$0xff] %v120_v29 }
 0x10d   :  { %256 = shalt.err (!%p253_p12)
}
 0x10e   :  { %s257_s6 = scalar_lea.hbm %s331_s3, 128 }
 0x10f   :  { %p258_p13 = scmp.ne.s32.totalorder %s331_s3, %s257_s6  ;;  %p261_p0 = scmp.lt.u32.totalorder %s257_s6, %s331_s3 }
 0x111   :  { %p263_p1 = pnand %p261_p0, %p258_p13 }
 0x113   :  { %266 = shalt.err (!%p263_p1)
}
 0x114   :  { %133 = dma.vmem_to_hbm [thread:$0]  %s131_s30, 128, %s331_s3, [#allocation4]  }
 0x115   :  { %269 = dma.done.wait [#allocation4], 128  }
 0x116   :  { %270 = vsyncadd [#allocation4], 4294967168 }
 0x117   :  { %137 = vsyncpa [#allocation3], 1 }
 0x118   :  { %138 = vsyncpa [#allocation4], 1 }

</bundles_post_ra>
